<compile_context>
chip_gen: v7x
topology: tpu7x:2x2x1
jax: 0.10.0
libtpu: 0.0.40
codegen_flags: <defaults>
</compile_context>

<pallas_src>
import functools

import jax
import jax.numpy as jnp
from jax.experimental import pallas as pl
from jax.experimental.pallas import tpu as pltpu

_LANES = 128
_SUBLANES = 8


def _round_up(x, m):
    return ((x + m - 1) // m) * m


def _round_down(x, m):
    return (x // m) * m


def _smooth_loss_kernel(t_ref, p_ref, o_ref, *, n_classes, rows_pb, cols,
                        rows_in_last):
    eps = jnp.float32(0.1)
    t = t_ref[...].astype(jnp.float32) * (1.0 - eps) + eps / jnp.float32(n_classes)
    p = p_ref[...].astype(jnp.float32)

    # (1 - targets.int()) applied to the *smoothed* targets, truncation toward
    # zero (exact semantic fidelity with the PyTorch module; cheap VPU op in a
    # memory-bound kernel).
    one_minus_tint = 1.0 - jnp.trunc(t)

    bce = t * jnp.log(p + jnp.float32(1e-10)) + one_minus_tint * jnp.log(
        1.0 - p + jnp.float32(1e-10))

    def reduce_to_tile(x):
        # (rows_pb, cols) -> (8, cols): split the sublane axis on an (8,128)
        # tile boundary (no data movement) and sum with elementwise VPU adds.
        return jnp.sum(x.reshape(rows_pb // _SUBLANES, _SUBLANES, cols), axis=0)

    if rows_in_last == rows_pb:
        # Every block is full -> no masking anywhere.
        o_ref[...] = reduce_to_tile(bce)
    else:
        # Only the last block contains rows past the end of the array (Pallas
        # leaves that region of the VMEM block undefined -> mask is mandatory
        # there).  All other blocks take the unmasked fast path.
        is_last = pl.program_id(0) == pl.num_programs(0) - 1

        @pl.when(jnp.logical_not(is_last))
        def _():
            o_ref[...] = reduce_to_tile(bce)

        @pl.when(is_last)
        def _():
            row = jax.lax.broadcasted_iota(jnp.int32, (rows_pb, cols), 0)
            masked = jnp.where(row < rows_in_last, bce, 0.0)
            o_ref[...] = reduce_to_tile(masked)


def smooth_loss(targets, predicts, *, target_block_bytes=2 * 1024 * 1024,
                min_blocks=4):
    """Label-smoothed BCE loss.  targets/predicts: same-shaped float arrays
    with the class axis last.  Returns a scalar f32 loss."""
    assert targets.shape == predicts.shape
    n_classes = targets.shape[-1]
    n_valid = targets.size

    # Choose a 2D view without ever copying the inputs:
    #  * lane-dense (rows, 128) flatten when the total size allows it,
    #  * otherwise tile the natural (N, C) layout with the full class dim.
    if n_valid % _LANES == 0:
        cols = _LANES
    else:
        cols = n_classes
    n_rows = n_valid // cols
    t2 = targets.reshape(n_rows, cols)
    p2 = predicts.reshape(n_rows, cols)

    # Block-row count: ~target_block_bytes per input block, rounded to the
    # packed-sublane multiple of the narrowest input dtype, and capped so the
    # grid has >= min_blocks blocks (keeps both v7x TensorCores busy; blocks
    # remain large enough for the v5e/v6e HBM roofline plateau).
    max_item = max(jnp.dtype(targets.dtype).itemsize,
                   jnp.dtype(predicts.dtype).itemsize)
    min_item = min(jnp.dtype(targets.dtype).itemsize,
                   jnp.dtype(predicts.dtype).itemsize)
    sub = max(_SUBLANES, 32 // min_item)

    rows_pb = max(sub, _round_down(target_block_bytes // (cols * max_item), sub))
    cap = _round_up(pl.cdiv(n_rows, min_blocks), sub)
    rows_pb = min(rows_pb, max(sub, cap))

    num_blocks = pl.cdiv(n_rows, rows_pb)
    rows_in_last = n_rows - (num_blocks - 1) * rows_pb

    kernel = functools.partial(
        _smooth_loss_kernel,
        n_classes=n_classes,
        rows_pb=rows_pb,
        cols=cols,
        rows_in_last=rows_in_last,
    )

    processed = num_blocks * rows_pb * cols
    cost = pl.CostEstimate(
        flops=10 * processed,
        transcendentals=2 * processed,
        bytes_accessed=n_valid * (jnp.dtype(targets.dtype).itemsize +
                                  jnp.dtype(predicts.dtype).itemsize)
        + 4 * num_blocks * _SUBLANES * cols,
    )

    partials = pl.pallas_call(
        kernel,
        out_shape=jax.ShapeDtypeStruct((num_blocks * _SUBLANES, cols),
                                       jnp.float32),
        grid_spec=pltpu.PrefetchScalarGridSpec(
            num_scalar_prefetch=0,
            grid=(num_blocks,),
            in_specs=[
                pl.BlockSpec((rows_pb, cols), lambda i: (i, 0)),
                pl.BlockSpec((rows_pb, cols), lambda i: (i, 0)),
            ],
            out_specs=pl.BlockSpec((_SUBLANES, cols), lambda i: (i, 0)),
        ),
        compiler_params=pltpu.CompilerParams(
            dimension_semantics=("parallel",)),
        cost_estimate=cost,
    )(t2, p2)

    # Tiny cross-lane reduction + mean + negate outside the kernel.  1/n is a
    # float64-derived constant (no f32 rounding of n_valid).
    return -jnp.sum(partials, dtype=jnp.float32) * jnp.float32(1.0 / n_valid)


def smooth_loss_ref(targets, predicts):
    eps = 0.1
    c = targets.shape[-1]
    t = targets * (1.0 - eps) + eps / c
    bce = t * jnp.log(predicts + 1e-10) + (1.0 - jnp.trunc(t)) * jnp.log(
        1.0 - predicts + 1e-10)
    return -jnp.mean(bce)


if __name__ == "__main__":
    key = jax.random.PRNGKey(0)

    test_cases = [
        # shape                      exercised path
        (16, 128),      # lane-dense flatten, multiple full blocks
        (64, 256),      # lane-dense flatten, 4-way parallel grid, no mask
        (6, 100),       # ragged C: (N, C) tiling, partial (masked) last block
        (2, 8, 32),     # 3-D, size multiple of 128, single partial block
    ]

    for idx, shape in enumerate(test_cases):
        k1, k2, key = jax.random.split(key, 3)
        targets = jax.random.bernoulli(k1, p=0.3, shape=shape).astype(
            jnp.float32)
        predicts = jax.random.uniform(
            k2, shape, dtype=jnp.float32, minval=0.01, maxval=0.99)

        loss = smooth_loss(targets, predicts)
        loss = jax.block_until_ready(loss)

        ref = smooth_loss_ref(targets, predicts)
        assert jnp.allclose(loss, ref, rtol=1e-5, atol=1e-5), (idx, loss, ref)

    print("KERNEL_OK")
</pallas_src>

<mosaic_0001>
module attributes {stable_mosaic.version = 11 : i64} {
  func.func @_smooth_loss_kernel(%arg0: i32, %arg1: memref<8x128xf32, #tpu.memory_space<vmem>>, %arg2: memref<8x128xf32, #tpu.memory_space<vmem>>, %arg3: memref<8x128xf32, #tpu.memory_space<vmem>>) attributes {dimension_semantics = [#tpu.dimension_semantics<parallel>], iteration_bounds = array<i64: 2>, scalar_prefetch = 0 : i64, scratch_operands = 0 : i64, tpu.core_type = #tpu.core_type<tc>, window_params = [{transform_indices = @transform_0, window_bounds = array<i64: 8, 128>}, {transform_indices = @transform_1, window_bounds = array<i64: 8, 128>}, {transform_indices = @transform_2, window_bounds = array<i64: 8, 128>}]} {
    %c0 = arith.constant 0 : index
    %c0_0 = arith.constant 0 : index
    %0 = vector.load %arg1[%c0, %c0_0] : memref<8x128xf32, #tpu.memory_space<vmem>>, vector<8x128xf32>
    %cst = arith.constant 1.000000e+00 : f32
    %cst_1 = arith.constant 1.000000e-01 : f32
    %1 = arith.subf %cst, %cst_1 : f32
    %2 = vector.broadcast %1 : f32 to vector<8x128xf32>
    %3 = arith.mulf %0, %2 : vector<8x128xf32>
    %cst_2 = arith.constant 1.000000e-01 : f32
    %cst_3 = arith.constant 1.280000e+02 : f32
    %4 = arith.divf %cst_2, %cst_3 : f32
    %5 = vector.broadcast %4 : f32 to vector<8x128xf32>
    %6 = arith.addf %3, %5 : vector<8x128xf32>
    %c0_4 = arith.constant 0 : index
    %c0_5 = arith.constant 0 : index
    %7 = vector.load %arg2[%c0_4, %c0_5] : memref<8x128xf32, #tpu.memory_space<vmem>>, vector<8x128xf32>
    %cst_6 = arith.constant 0.000000e+00 : f32
    %8 = vector.broadcast %cst_6 : f32 to vector<8x128xf32>
    %9 = arith.cmpf olt, %6, %8 : vector<8x128xf32>
    %10 = math.ceil %6 : vector<8x128xf32>
    %11 = math.floor %6 : vector<8x128xf32>
    %12 = arith.select %9, %10, %11 : vector<8x128xi1>, vector<8x128xf32>
    %cst_7 = arith.constant 1.000000e+00 : f32
    %13 = vector.broadcast %cst_7 : f32 to vector<8x128xf32>
    %14 = arith.subf %13, %12 : vector<8x128xf32>
    %cst_8 = arith.constant 1.000000e-10 : f32
    %15 = vector.broadcast %cst_8 : f32 to vector<8x128xf32>
    %16 = arith.addf %7, %15 : vector<8x128xf32>
    %17 = math.log %16 : vector<8x128xf32>
    %18 = arith.mulf %6, %17 : vector<8x128xf32>
    %cst_9 = arith.constant 1.000000e+00 : f32
    %19 = vector.broadcast %cst_9 : f32 to vector<8x128xf32>
    %20 = arith.subf %19, %7 : vector<8x128xf32>
    %cst_10 = arith.constant 1.000000e-10 : f32
    %21 = vector.broadcast %cst_10 : f32 to vector<8x128xf32>
    %22 = arith.addf %20, %21 : vector<8x128xf32>
    %23 = math.log %22 : vector<8x128xf32>
    %24 = arith.mulf %14, %23 : vector<8x128xf32>
    %25 = arith.addf %18, %24 : vector<8x128xf32>
    %26 = vector.shape_cast %25 : vector<8x128xf32> to vector<1x8x128xf32>
    %cst_11 = arith.constant dense<0.000000e+00> : vector<8x128xf32>
    %27 = vector.multi_reduction <add>, %26, %cst_11 [0] : vector<1x8x128xf32> to vector<8x128xf32>
    %c0_12 = arith.constant 0 : index
    %c0_13 = arith.constant 0 : index
    %28 = vector.load %arg3[%c0_12, %c0_13] : memref<8x128xf32, #tpu.memory_space<vmem>>, vector<8x128xf32>
    tpu.vector_store %arg3[%c0_12, %c0_13], %27 {strides = array<i32>} : memref<8x128xf32, #tpu.memory_space<vmem>>, vector<8x128xf32>,
    return
  }
  func.func @transform_0(%arg0: i32) -> (i32, i32) {
    %c0_i32 = arith.constant 0 : i32
    %c0_i32_0 = arith.constant 0 : i32
    return %arg0, %c0_i32 : i32, i32
  }
  func.func @transform_1(%arg0: i32) -> (i32, i32) {
    %c0_i32 = arith.constant 0 : i32
    %c0_i32_0 = arith.constant 0 : i32
    return %arg0, %c0_i32 : i32, i32
  }
  func.func @transform_2(%arg0: i32) -> (i32, i32) {
    %c0_i32 = arith.constant 0 : i32
    %c0_i32_0 = arith.constant 0 : i32
    return %arg0, %c0_i32 : i32, i32
  }
}

</mosaic_0001>

<bundles_post_ra>
// kernel: tpu_custom_call.1
= control target key start
LH: loop header
LB: loop body
LE: loop exit
PB: predicated region body
PF: predicated region fallthrough
CT: control target
= control target key end

     0   :  { %7 = vsyncpa [#allocation3], 0  ;;  %s758_s0 = inlined_call_operand.hbm [shape: f32[16,128], index: 0, kind: input, shape index: {}]   ;;  %s759_s1 = inlined_call_operand.hbm [shape: f32[16,128], index: 1, kind: input, shape index: {}]   ;;  %s760_s2 = inlined_call_operand.hbm [shape: f32[16,128], index: 2, kind: output, shape index: {}]  }
   0x1   :  { %9 = vsyncpa [#allocation3 + $0x1], 0 }
   0x2   :  { %10 = vsyncpa [#allocation6], 0 }
   0x3   :  { %12 = vsyncpa [#allocation6 + $0x1], 0 }
   0x4   :  { %13 = vsyncpa [#allocation4], 0 }
   0x5   :  { %15 = vsyncpa [#allocation4 + $0x1], 0  ;;  %s544_s9 = smov 0   ;;  %s546_s10 = smov 0  }
   0x6   :  { %s548_s11 = smov 0   ;;  %s550_s12 = smov 0  }
   0x7 LB: > { %s565_s13 = sadd.s32 4294967295, %s524_s12   ;;  %s324_s14 = sadd.s32 4294967294, %s524_s12   ;;  %s524_s12 = sphi %s550_s12, %s779_s12   ;;  %s520_s11 = sphi %s548_s11, %s778_s11   ;;  %s516_s10 = sphi %s546_s10, %s777_s10   ;;  %s512_s9 = sphi %s544_s9, %s776_s9  }
   0x8   : > { %s569_s15 = sadd.s32 1, %s524_s12   ;;  %s28_s16 = sadd.s32 1, %s520_s11 }
   0x9   : > { %s25_s17 = ssub.s32 %s524_s12, %s569_s15  ;;  %p35_p0 = scmp.ne.s32.totalorder %s520_s11, %s516_s10 }
   0xa   : > { %p26_p1 = scmp.eq.s32.totalorder %s25_s17, 0  ;;  %p36_p2 = scmp.eq.s32.totalorder %s524_s12, 0 }
   0xb   : > { %p41_p3 = scmp.ne.s32.totalorder %s516_s10, %s512_s9  ;;  %p42_p4 = scmp.eq.s32.totalorder %s565_s13, 0 }
   0xc   : > { %s581_s18 = scalar_select %p26_p1, %s520_s11, %s28_s16  }
   0xd   : > { %p583_p5 = por %p36_p2, %p35_p0  ;;  %p587_p6 = por %p42_p4, %p41_p3 }
   0xe   : > { %p91_p7 = scmp.eq.s32.totalorder %s565_s13, 1  ;;  %p97_p8 = scmp.eq.s32.totalorder %s324_s14, 1 }
   0xf   : > { %s764_s20 = scalar_select %p587_p6, 1, 0 }
  0x10   : > { %p356_p10 = scmp.lt.s32.totalorder %s524_s12, 2  ;;  %p594_p11 = por %p91_p7, %p35_p0 }
  0x11   : > { %p598_p12 = por %p97_p8, %p41_p3  ;;  %s603_s23 = sand.u32 1, %s520_s11  }
  0x12   : > { %s765_s21 = scalar_select %p594_p11, 1, 0 }
  0x13   : > { %s766_s22 = scalar_select %p598_p12, 1, 0 }
  0x14   : > { %s328_s24 = sshll.u32 %s524_s12, 7  ;;  %s327_s25 = sshll.u32 %s603_s23, 3 }
  0x15   : > { %s612_s28 = scalar_lea.hbm %s758_s0, %s328_s24  ;;  %s121_s29 = scalar_lea.vmem [#allocation2], %s327_s25 }
  0x16   : > { %s128_s30 = sshll.u32 %s121_s29, 4  ;;  %p618_p13 = pnand %p356_p10, %p583_p5  ;;  %s622_s30 = int_to_ptr.vmem [resolvable:$true] %s128_s30 }
  0x17   : > { %s118_s4 = scalar_lea.sflag [#allocation3], %s603_s23  ;;  %s394_s5 = scalar_lea.hbm %s612_s28, 128 }
  0x18   : > { %p395_p2 = scmp.ne.s32.totalorder %s612_s28, %s394_s5  ;;  %p396_p3 = pneg %p618_p13 }
  0x19   : > { %s399_s8 = scalar_lea.hbm %s758_s0, 256  ;;  %p400_p5 = scmp.lt.u32.totalorder %s612_s28, %s758_s0 }
  0x1a   : > { %p397_p4 = pnand %p396_p3, %p395_p2  ;;  %p401_p8 = scmp.lt.u32.totalorder %s399_s8, %s394_s5 }
  0x1b   : > { %p403_p9 = scmp.lt.u32.totalorder %s394_s5, %s612_s28 }
  0x1c   : > { %p398_p7 = pneg %p397_p4  ;;  %p402_p10 = por %p401_p8, %p400_p5 }
  0x1e   : > { %p404_p0 = por %p403_p9, %p402_p10 }
  0x20   : > { %p405_p1 = pnand %p404_p0, %p398_p7 }
  0x22   : > { %408 = shalt.err (!%p405_p1)
}
  0x23   : > { %s409_s17 = scalar_lea.vmem %s622_s30, 128  ;;  %s526_s19 = smov [#allocation2]  }
  0x24   : > { %p410_p2 = scmp.ne.s32.totalorder %s622_s30, %s409_s17  ;;  %s414_s26 = sshll.u32 %s526_s19, 4  ;;  %s415_s26 = int_to_ptr.vmem [resolvable:$false] %s414_s26 }
  0x25   : > { %s416_s27 = scalar_lea.vmem %s415_s26, 256  ;;  %p417_p11 = scmp.lt.s32.totalorder %s622_s30, %s415_s26 }
  0x26   : > { %p412_p4 = pnand %p410_p2, %p396_p3  ;;  %p418_p5 = scmp.lt.s32.totalorder %s416_s27, %s409_s17 }
  0x28   : > { %p413_p12 = pneg %p412_p4  ;;  %p419_p8 = por %p418_p5, %p417_p11 }
  0x2a   : > { %p420_p9 = pnand %p419_p8, %p413_p12 }
  0x2c   : > { %423 = shalt.err (!%p420_p9)
}
  0x2d   : > { %348 = dma.hbm_to_vmem [thread:$0]  (!%p618_p13), %s612_s28, 128, %s622_s30, %s118_s4  }
  0x2e   : > { %p768_p0 = scmp.lt.s32.totalorder %s524_s12, 3  ;;  %p769_p1 = scmp.ge.s32.totalorder %s524_s12, 1 }
  0x2f   : > { %s665_s7 = scalar_lea.hbm %s759_s1, %s328_s24  ;;  %s139_s8 = scalar_lea.vmem [#allocation5], %s327_s25 }
  0x30   : > { %p656_p7 = pnand %p769_p1, %p768_p0  ;;  %s146_s14 = sshll.u32 %s139_s8, 4  ;;  %s147_s14 = int_to_ptr.vmem [resolvable:$true] %s146_s14 }
  0x31   : > { %s136_s28 = scalar_lea.sflag [#allocation6], %s603_s23  ;;  %s424_s30 = scalar_lea.hbm %s665_s7, 128 }
  0x32   : > { %s770_s29 = scalar_select %p656_p7, 1, 0 }
  0x33   : > { %p425_p11 = scmp.ne.s32.totalorder %s665_s7, %s424_s30  ;;  %s429_s24 = scalar_lea.hbm %s759_s1, 256 }
  0x34   : > { %p430_p2 = scmp.lt.u32.totalorder %s665_s7, %s759_s1  ;;  %p431_p4 = scmp.lt.u32.totalorder %s429_s24, %s424_s30 }
  0x35   : > { %p427_p12 = pnand %p425_p11, %p396_p3  ;;  %p433_p8 = scmp.lt.u32.totalorder %s424_s30, %s665_s7 }
  0x36   : > { %p432_p5 = por %p431_p4, %p430_p2 }
  0x37   : > { %p428_p10 = pneg %p427_p12 }
  0x38   : > { %p434_p9 = por %p433_p8, %p432_p5 }
  0x3a   : > { %p435_p0 = pnand %p434_p9, %p428_p10 }
  0x3c   : > { %438 = shalt.err (!%p435_p0)
}
  0x3d   : > { %s439_s23 = scalar_lea.vmem %s147_s14, 128  ;;  %s527_s25 = smov [#allocation5]  }
  0x3e   : > { %p440_p1 = scmp.ne.s32.totalorder %s147_s14, %s439_s23  ;;  %s444_s26 = sshll.u32 %s527_s25, 4  ;;  %s445_s26 = int_to_ptr.vmem [resolvable:$false] %s444_s26 }
  0x3f   : > { %s446_s27 = scalar_lea.vmem %s445_s26, 256  ;;  %p447_p6 = scmp.lt.s32.totalorder %s147_s14, %s445_s26 }
  0x40   : > { %p442_p11 = pnand %p440_p1, %p396_p3  ;;  %p448_p7 = scmp.lt.s32.totalorder %s446_s27, %s439_s23 }
  0x42   : > { %p443_p12 = pneg %p442_p11  ;;  %p449_p2 = por %p448_p7, %p447_p6 }
  0x44   : > { %p450_p4 = pnand %p449_p2, %p443_p12 }
  0x46   : > { %453 = shalt.err (!%p450_p4)
}
  0x47   : > { %351 = dma.hbm_to_vmem [thread:$0]  (!%p618_p13), %s665_s7, 128, %s147_s14, %s136_s28  }
  0x48   : > { %p771_p10 = scmp.ne.s32.totalorder %s770_s29, 0 }
  0x49   : > { %s692_s5 = sand.u32 (!%p771_p10), 1, %s516_s10   ;;  %p772_p6 = scmp.ne.s32.totalorder (!%p771_p10), %s764_s20, 0 }
  0x4a   : > { %155 = sbr.rel (%p771_p10) target bundleno = 120 (0x78), region = 28  ;;  %s695_s6 = sshll.u32 (!%p771_p10), %s692_s5, 3 }
  0x4b   : > { %s158_s8 = scalar_lea.sflag (!%p771_p10), [#allocation3], %s692_s5  ;;  %s161_s30 = scalar_lea.vmem (!%p771_p10), [#allocation2], %s695_s6 }
  0x51   : > { %499 = dma.done.wait (%p772_p6), %s158_s8, 128  }
  0x52   : > { %501 = vsyncadd (%p772_p6), %s158_s8, 4294967168  ;;  %s167_s3 = scalar_lea.sflag [#allocation6], %s692_s5  ;;  %s170_s29 = scalar_lea.vmem [#allocation5], %s695_s6 }
  0x53   : > { %503 = dma.done.wait (%p772_p6), %s167_s3, 128  }
  0x54   : > { %505 = vsyncadd (%p772_p6), %s167_s3, 4294967168  ;;  %v196_v0 = vld [vmem:[%s161_s30] sm:$0xff]  ;;  %v199_v1 = vld [vmem:[%s170_s29] sm:$0xff]  ;;  %s195_s20 = scalar_lea.vmem [#allocation7], %s695_s6  ;;  %s336_s14 = sshll.u32 %s565_s13, 7 }
  0x55   : > { %v197_v2 = vmul.f32 0.9, %v196_v0  ;;  %v205_v3 = vadd.f32 1e-10, %v199_v1  ;;  %v209_v4 = vsub.f32 1.0, %v199_v1  ;;  %s231_s7 = sshll.u32 %s195_s20, 4  ;;  %s716_s16 = scalar_lea.hbm %s760_s2, %s336_s14  ;;  %s711_s7 = int_to_ptr.vmem [resolvable:$true] %s231_s7 }
  0x56   : > { %s218_s24 = scalar_lea.sflag [#allocation4], %s692_s5  ;;  %s454_s17 = scalar_lea.vmem %s711_s7, 128 }
  0x57   : > { %v198_v5 = vadd.f32 0.00078125, %v197_v2  ;;  %390 = vlog2.f32 %v205_v3  ;;  %v210_v6 = vadd.f32 1e-10, %v209_v4  ;;  %p455_p13 = scmp.ne.s32.totalorder %s711_s7, %s454_s17  ;;  %p773_p3 = scmp.ne.s32.totalorder %s765_s21, 0 }
  0x58   : > { %s528_s13 = smov [#allocation7]  }
  0x59   : > { %392 = vlog2.f32 %v210_v6  ;;  %v201_v7 = vceil.f32 %v198_v5  ;;  %v202_v8 = vfloor.f32 %v198_v5  ;;  %vm200_vm0 = vcmp.lt.f32.partialorder %v198_v5, 0.0  ;;  %p456_p7 = pnand %p455_p13, %p773_p3  ;;  %s458_s19 = sshll.u32 %s528_s13, 4  ;;  %s459_s19 = int_to_ptr.vmem [resolvable:$false] %s458_s19 }
  0x5a   : > { %s460_s23 = scalar_lea.vmem %s459_s19, 256  ;;  %p461_p8 = scmp.lt.s32.totalorder %s711_s7, %s459_s19 }
  0x5b   : > { %v203_v9 = vsel %vm200_vm0, %v201_v7, %v202_v8  ;;  %p457_p5 = pneg %p456_p7  ;;  %p462_p9 = scmp.lt.s32.totalorder %s460_s23, %s454_s17 }
  0x5c   : > { %v204_v11 = vsub.f32 1.0, %v203_v9 }
  0x5d   : > { %p463_p0 = por %p462_p9, %p461_p8 }
  0x5f   : > { %p464_p1 = pnand %p463_p0, %p457_p5 }
  0x61   : > { %v391_v10 = vpop.eup %390 }
  0x62   : > { %v207_v12 = vmul.f32 0.6931472, %v391_v10 }
  0x63   : > { %v393_v13 = vpop.eup %392 }
  0x64   : > { %v208_v14 = vmul.f32 %v207_v12, %v198_v5  ;;  %v212_v15 = vmul.f32 0.6931472, %v393_v13 }
  0x66   : > { %v213_v16 = vmul.f32 %v212_v15, %v204_v11 }
  0x68   : > { %v214_v17 = vadd.f32 %v213_v16, %v208_v14 }
  0x6a   : > { %216 = vst [vmem:[%s195_s20] sm:$0xff] %v214_v17 }
  0x6b   : > { %467 = shalt.err (!%p464_p1)
}
  0x6c   : > { %s468_s25 = scalar_lea.hbm %s716_s16, 128  ;;  %s472_s5 = scalar_lea.hbm %s760_s2, 256 }
  0x6d   : > { %p469_p11 = scmp.ne.s32.totalorder %s716_s16, %s468_s25  ;;  %p473_p4 = scmp.lt.u32.totalorder %s716_s16, %s760_s2 }
  0x6e   : > { %p474_p10 = scmp.lt.u32.totalorder %s472_s5, %s468_s25  ;;  %p476_p13 = scmp.lt.u32.totalorder %s468_s25, %s716_s16 }
  0x6f   : > { %p470_p12 = pnand %p469_p11, %p773_p3 }
  0x70   : > { %p475_p6 = por %p474_p10, %p473_p4 }
  0x71   : > { %p471_p2 = pneg %p470_p12 }
  0x72   : > { %p477_p7 = por %p476_p13, %p475_p6 }
  0x74   : > { %p478_p5 = pnand %p477_p7, %p471_p2 }
  0x76   : > { %481 = shalt.err (!%p478_p5)
}
  0x77   : > { %343 = dma.vmem_to_hbm [thread:$0]  (%p773_p3), %s711_s7, 128, %s716_s16, %s218_s24  }
  0x78 PF: > { %s243_s30 = sand.u32 1, %s512_s9   ;;  %p774_p8 = scmp.ne.s32.totalorder %s766_s22, 0 }
  0x79   : > { %p775_p9 = scmp.ge.s32.totalorder %s524_s12, 2  ;;  %s244_s3 = scalar_lea.sflag [#allocation4], %s243_s30 }
  0x7b   : > { %p353_p0 = pnand %p775_p9, %p774_p8 }
  0x7d   : > { %507 = dma.done.wait (!%p353_p0), %s244_s3, 128  }
  0x7e   : > { %509 = vsyncadd (!%p353_p0), %s244_s3, 4294967168  ;;  %p18_p1 = scmp.ge.s32.totalorder %s569_s15, 4   ;;  %s776_s9 = smov %s516_s10 }
  0x7f   : > { %s777_s10 = smov %s520_s11  ;;  %s778_s11 = smov %s581_s18 }
  0x80   : > { %s779_s12 = smov %s569_s15  ;;  %20 = sbr.rel (!%p18_p1) target bundleno = 7 (0x7), region = 86 }
  0x87   :  { %249 = vsyncpa [#allocation3], 1 }
  0x88   :  { %251 = vsyncpa [#allocation3 + $0x1], 1 }
  0x89   :  { %252 = vsyncpa [#allocation6], 1 }
  0x8a   :  { %254 = vsyncpa [#allocation6 + $0x1], 1 }
  0x8b   :  { %255 = vsyncpa [#allocation4], 1 }
  0x8c   :  { %257 = vsyncpa [#allocation4 + $0x1], 1 }

</bundles_post_ra>
